<compile_context>
chip_gen: v6e
topology: v6e:2x2x1
jax: 0.10.0
libtpu: 0.0.40
codegen_flags: <defaults>
</compile_context>

<pallas_src>
import jax
import jax.numpy as jnp
from jax.experimental import pallas as pl
from jax.experimental.pallas import tpu as pltpu


def _round_up(n, m):
    return ((n + m - 1) // m) * m


def _mlp_kernel(x_ref, w1_ref, b1_ref, w2_ref, b2_ref, w3_ref, b3_ref, o_ref):
    # x arrives as f32 (no wrapper-side cast / pad); cast to bf16 on the VPU right before
    # the MXU matmul.  STG gates are already folded into w1 by prepare_params().
    x = x_ref[...].astype(jnp.bfloat16)
    h1 = jnp.dot(x, w1_ref[...], preferred_element_type=jnp.float32) + b1_ref[...]
    h1 = jnp.maximum(h1, 0.0)                      # ReLU (Dropout = identity at eval)
    h2 = jnp.dot(h1.astype(jnp.bfloat16), w2_ref[...],
                 preferred_element_type=jnp.float32) + b2_ref[...]
    h2 = jnp.maximum(h2, 0.0)
    # Final Linear(H4, 1): VPU broadcast-multiply + lane reduction instead of an
    # N=1 MXU matmul (which would use a single MXU output lane).
    o = jnp.sum(h2 * w3_ref[...], axis=-1, keepdims=True) + b3_ref[...]
    o_ref[...] = o.astype(o_ref.dtype)


def prepare_params(params):
    """One-time weight prep (hoisted out of the per-call path): fold the eval-mode STG
    gates into W1 ((x*g) @ W1 == x @ (g[:,None]*W1)) and cast the MXU weights to bf16."""
    mu, w1, b1, w2, b2, w3, b3 = params
    C, H2 = w1.shape
    H4 = w2.shape[1]
    gates = jnp.clip(mu + 0.5, 0.0, 1.0)                    # (1, C) eval-mode gates
    w1g = (gates.reshape(C, 1) * w1).astype(jnp.bfloat16)   # (C, H2)
    return (w1g,
            b1.reshape(1, H2).astype(jnp.float32),
            w2.astype(jnp.bfloat16),
            b2.reshape(1, H4).astype(jnp.float32),
            w3.reshape(1, H4).astype(jnp.float32),           # VPU reduction weight, keep f32
            b3.reshape(1, 1).astype(jnp.float32))


def _vmem_capacity_bytes():
    try:
        return int(pltpu.get_tpu_info().vmem_capacity_bytes)
    except Exception:
        return 64 << 20          # conservative fallback (v7x per-TensorCore VMEM)


def _vmem_bytes(tb, C, H2, H4):
    x_io = 2 * tb * C * 4                        # f32 x block, double-buffered
    out_io = 2 * tb * 128 * 4                    # (tb,1) out block (lane-padded), double-buffered
    wts = C * H2 * 2 + H2 * H4 * 2               # W1 / W2 bf16, single-buffered
    wts += 4 * (H2 + 2 * H4 + 1) * 4             # biases + w3 row (allow double buffers)
    tmp = tb * (H2 + H4) * 6 + tb * 128 * 4      # h1/h2 (f32 + bf16 copies) + o
    return x_io + out_io + wts + tmp + (2 << 20)  # + Mosaic internal scratch slack


def _choose_tile(B, C, H2, H4, budget):
    # Target an x tile of ~4 MiB f32 so per-grid-step overhead (~0.35 us) is amortized.
    tb = _round_up(max(8, (4 << 20) // max(4 * C, 1)), 8)
    tb = min(tb, 8192)
    if B >= 1024:
        # Keep >=2 grid steps so the "parallel" batch axis feeds both v7x TensorCores.
        tb = min(tb, _round_up(pl.cdiv(B, 2), 8))
    if B <= tb:
        tb = B                   # one block = whole batch (full-dim block is always legal)
    # Shrink until the footprint fits the per-chip VMEM budget.
    while tb > 8 and _vmem_bytes(tb, C, H2, H4) > budget:
        nxt = _round_up(max(8, tb // 2), 8)
        if nxt >= tb:
            break
        tb = nxt
    return max(tb, 1)


def _build_specs(tb, C, H2, H4, single_buffer_weights):
    pm = pl.Buffered(1) if single_buffer_weights else None

    def const(shape):
        idx = lambda i, _n=len(shape): (0,) * _n
        if pm is None:
            return pl.BlockSpec(shape, idx)
        # Grid-invariant blocks: nothing to pipeline, so single-buffer to halve VMEM use.
        return pl.BlockSpec(shape, idx, pipeline_mode=pm)

    in_specs = [
        pl.BlockSpec((tb, C), lambda i: (i, 0)),   # x tile (f32), pipelined over the batch
        const((C, H2)),                            # W1 (gates folded in), grid-invariant
        const((1, H2)),                            # b1
        const((H2, H4)),                           # W2
        const((1, H4)),                            # b2
        const((1, H4)),                            # w3 as a row (VPU reduction weight)
        const((1, 1)),                             # b3
    ]
    # (tb, 1) output: masked 1-lane stores are noise next to the x DMA for C >= 16.
    out_specs = pl.BlockSpec((tb, 1), lambda i: (i, 0))
    return in_specs, out_specs


def model_forward(x, per_x, prepped_params):
    """x: (B, C) f32.  per_x is accepted for API parity with Model.forward(x, per_x) but
    the eval-mode selector does not use it, so it is never DMA'd."""
    del per_x
    w1, b1, w2, b2, w3_row, b3 = prepped_params
    B, C = x.shape
    H2 = w1.shape[1]
    H4 = w2.shape[1]

    vmem_cap = _vmem_capacity_bytes()
    vmem_limit = max(vmem_cap - (8 << 20), 16 << 20)   # leave headroom for Mosaic scratch
    budget = vmem_limit - (4 << 20)
    tb = _choose_tile(B, C, H2, H4, budget)
    grid = (pl.cdiv(B, tb),)   # ragged grid: partial final block is masked by Pallas;
                               # rows are independent so garbage pad rows never reach HBM.

    def run(single_buffer_weights):
        in_specs, out_specs = _build_specs(tb, C, H2, H4, single_buffer_weights)
        return pl.pallas_call(
            _mlp_kernel,
            out_shape=jax.ShapeDtypeStruct((B, 1), jnp.float32),
            grid=grid,
            in_specs=in_specs,
            out_specs=out_specs,
            compiler_params=pltpu.CompilerParams(
                dimension_semantics=("parallel",),
                vmem_limit_bytes=int(vmem_limit)),
        )(x, w1, b1, w2, b2, w3_row, b3)

    try:
        return run(single_buffer_weights=True)
    except Exception:
        # Fallback if this jax build rejects pipeline_mode=pl.Buffered(1) on invariant
        # weight specs; default double-buffering is still correct (just uses more VMEM).
        return run(single_buffer_weights=False)


def init_params(key, num_coeffs):
    C = num_coeffs
    H2 = C // 2
    H4 = C // 4
    ks = jax.random.split(key, 7)

    def linear(kw, kb, fan_in, fan_out):
        bound = 1.0 / jnp.sqrt(fan_in)
        w = jax.random.uniform(kw, (fan_in, fan_out), jnp.float32, -bound, bound)
        b = jax.random.uniform(kb, (1, fan_out), jnp.float32, -bound, bound)
        return w, b

    mu = 0.5 * jax.random.normal(ks[0], (1, C), jnp.float32)   # selector gate params
    w1, b1 = linear(ks[1], ks[2], C, H2)
    w2, b2 = linear(ks[3], ks[4], H2, H4)
    w3, b3 = linear(ks[5], ks[6], H4, 1)
    return (mu, w1, b1, w2, b2, w3, b3)


def reference_forward(x, per_x, params):
    """Plain-JAX reference mirroring the kernel's numeric path (gate fold + bf16 matmuls)."""
    del per_x
    mu, w1, b1, w2, b2, w3, b3 = params
    gates = jnp.clip(mu + 0.5, 0.0, 1.0)
    w1g = (gates.reshape(-1, 1) * w1).astype(jnp.bfloat16)
    h1 = jnp.maximum(jnp.dot(x.astype(jnp.bfloat16), w1g,
                             preferred_element_type=jnp.float32) + b1, 0.0)
    h2 = jnp.maximum(jnp.dot(h1.astype(jnp.bfloat16), w2.astype(jnp.bfloat16),
                             preferred_element_type=jnp.float32) + b2, 0.0)
    return jnp.sum(h2 * w3.reshape(1, -1), axis=-1, keepdims=True) + b3.reshape(1, 1)


if __name__ == "__main__":
    B = 8            # batch
    num_coeffs = 64  # C -> hidden 32 -> 16 -> 1

    key = jax.random.PRNGKey(0)
    kx, kp, kparams = jax.random.split(key, 3)
    x = jax.random.normal(kx, (B, num_coeffs), jnp.float32)
    per_x = jax.random.normal(kp, (B, num_coeffs), jnp.float32)
    params = init_params(kparams, num_coeffs)
    prepped = prepare_params(params)   # one-time weight prep, hoisted out of the forward

    out = jax.block_until_ready(model_forward(x, per_x, prepped))
    ref = reference_forward(x, per_x, params)

    assert out.shape == (B, 1), out.shape
    assert jnp.allclose(out, ref, atol=2e-2, rtol=2e-2), (out, ref)

    print("KERNEL_OK")
</pallas_src>

<mosaic_0001>
module attributes {stable_mosaic.version = 11 : i64} {
  func.func @_mlp_kernel(%arg0: i32, %arg1: memref<8x64xf32, #tpu.memory_space<vmem>>, %arg2: memref<64x32xbf16, #tpu.memory_space<vmem>>, %arg3: memref<1x32xf32, #tpu.memory_space<vmem>>, %arg4: memref<32x16xbf16, #tpu.memory_space<vmem>>, %arg5: memref<1x16xf32, #tpu.memory_space<vmem>>, %arg6: memref<1x16xf32, #tpu.memory_space<vmem>>, %arg7: memref<1x1xf32, #tpu.memory_space<vmem>>, %arg8: memref<8x1xf32, #tpu.memory_space<vmem>>) attributes {dimension_semantics = [#tpu.dimension_semantics<parallel>], iteration_bounds = array<i64: 1>, scalar_prefetch = 0 : i64, scratch_operands = 0 : i64, tpu.core_type = #tpu.core_type<tc>, window_params = [{transform_indices = @transform_0, window_bounds = array<i64: 8, 64>}, {pipeline_mode = #tpu.pipeline_mode<synchronous>, transform_indices = @transform_1, window_bounds = array<i64: 64, 32>}, {pipeline_mode = #tpu.pipeline_mode<synchronous>, transform_indices = @transform_2, window_bounds = array<i64: 1, 32>}, {pipeline_mode = #tpu.pipeline_mode<synchronous>, transform_indices = @transform_3, window_bounds = array<i64: 32, 16>}, {pipeline_mode = #tpu.pipeline_mode<synchronous>, transform_indices = @transform_4, window_bounds = array<i64: 1, 16>}, {pipeline_mode = #tpu.pipeline_mode<synchronous>, transform_indices = @transform_5, window_bounds = array<i64: 1, 16>}, {pipeline_mode = #tpu.pipeline_mode<synchronous>, transform_indices = @transform_6, window_bounds = array<i64: 1, 1>}, {transform_indices = @transform_7, window_bounds = array<i64: 8, 1>}]} {
    %c0 = arith.constant 0 : index
    %c0_0 = arith.constant 0 : index
    %0 = vector.load %arg1[%c0, %c0_0] : memref<8x64xf32, #tpu.memory_space<vmem>>, vector<8x64xf32>
    %1 = arith.truncf %0 : vector<8x64xf32> to vector<8x64xbf16>
    %c0_1 = arith.constant 0 : index
    %c0_2 = arith.constant 0 : index
    %2 = vector.load %arg2[%c0_1, %c0_2] : memref<64x32xbf16, #tpu.memory_space<vmem>>, vector<64x32xbf16>
    %cst = arith.constant dense<0.000000e+00> : vector<8x32xf32>
    %3 = tpu.matmul %1, %2, %cst {dimension_numbers = #tpu.dot_dimension_numbers<[1], [0], [0], [1], [0, 0, 1, 1], [], []>} : vector<8x64xbf16>, vector<64x32xbf16>, vector<8x32xf32> -> vector<8x32xf32>
    %c0_3 = arith.constant 0 : index
    %c0_4 = arith.constant 0 : index
    %4 = vector.load %arg3[%c0_3, %c0_4] : memref<1x32xf32, #tpu.memory_space<vmem>>, vector<1x32xf32>
    %5 = vector.broadcast %4 : vector<1x32xf32> to vector<8x32xf32>
    %6 = arith.addf %3, %5 : vector<8x32xf32>
    %cst_5 = arith.constant 0.000000e+00 : f32
    %7 = vector.broadcast %cst_5 : f32 to vector<8x32xf32>
    %8 = arith.maximumf %6, %7 : vector<8x32xf32>
    %9 = arith.truncf %8 : vector<8x32xf32> to vector<8x32xbf16>
    %c0_6 = arith.constant 0 : index
    %c0_7 = arith.constant 0 : index
    %10 = vector.load %arg4[%c0_6, %c0_7] : memref<32x16xbf16, #tpu.memory_space<vmem>>, vector<32x16xbf16>
    %cst_8 = arith.constant dense<0.000000e+00> : vector<8x16xf32>
    %11 = tpu.matmul %9, %10, %cst_8 {dimension_numbers = #tpu.dot_dimension_numbers<[1], [0], [0], [1], [0, 0, 1, 1], [], []>} : vector<8x32xbf16>, vector<32x16xbf16>, vector<8x16xf32> -> vector<8x16xf32>
    %c0_9 = arith.constant 0 : index
    %c0_10 = arith.constant 0 : index
    %12 = vector.load %arg5[%c0_9, %c0_10] : memref<1x16xf32, #tpu.memory_space<vmem>>, vector<1x16xf32>
    %13 = vector.broadcast %12 : vector<1x16xf32> to vector<8x16xf32>
    %14 = arith.addf %11, %13 : vector<8x16xf32>
    %cst_11 = arith.constant 0.000000e+00 : f32
    %15 = vector.broadcast %cst_11 : f32 to vector<8x16xf32>
    %16 = arith.maximumf %14, %15 : vector<8x16xf32>
    %c0_12 = arith.constant 0 : index
    %c0_13 = arith.constant 0 : index
    %17 = vector.load %arg6[%c0_12, %c0_13] : memref<1x16xf32, #tpu.memory_space<vmem>>, vector<1x16xf32>
    %18 = vector.broadcast %17 : vector<1x16xf32> to vector<8x16xf32>
    %19 = arith.mulf %16, %18 : vector<8x16xf32>
    %cst_14 = arith.constant dense<0.000000e+00> : vector<8xf32>
    %20 = vector.multi_reduction <add>, %19, %cst_14 [1] : vector<8x16xf32> to vector<8xf32>
    %21 = vector.shape_cast %20 : vector<8xf32> to vector<8x1xf32>
    %c0_15 = arith.constant 0 : index
    %c0_16 = arith.constant 0 : index
    %22 = vector.load %arg7[%c0_15, %c0_16] : memref<1x1xf32, #tpu.memory_space<vmem>>, vector<1x1xf32>
    %23 = vector.broadcast %22 : vector<1x1xf32> to vector<8x1xf32>
    %24 = arith.addf %21, %23 : vector<8x1xf32>
    %c0_17 = arith.constant 0 : index
    %c0_18 = arith.constant 0 : index
    %25 = vector.load %arg8[%c0_17, %c0_18] : memref<8x1xf32, #tpu.memory_space<vmem>>, vector<8x1xf32>
    tpu.vector_store %arg8[%c0_17, %c0_18], %24 {strides = array<i32>} : memref<8x1xf32, #tpu.memory_space<vmem>>, vector<8x1xf32>,
    return
  }
  func.func @transform_0(%arg0: i32) -> (i32, i32) {
    %c0_i32 = arith.constant 0 : i32
    %c0_i32_0 = arith.constant 0 : i32
    return %arg0, %c0_i32 : i32, i32
  }
  func.func @transform_1(%arg0: i32) -> (i32, i32) {
    %c0_i32 = arith.constant 0 : i32
    %c0_i32_0 = arith.constant 0 : i32
    %c0_i32_1 = arith.constant 0 : i32
    return %c0_i32, %c0_i32_0 : i32, i32
  }
  func.func @transform_2(%arg0: i32) -> (i32, i32) {
    %c0_i32 = arith.constant 0 : i32
    %c0_i32_0 = arith.constant 0 : i32
    %c0_i32_1 = arith.constant 0 : i32
    return %c0_i32, %c0_i32_0 : i32, i32
  }
  func.func @transform_3(%arg0: i32) -> (i32, i32) {
    %c0_i32 = arith.constant 0 : i32
    %c0_i32_0 = arith.constant 0 : i32
    %c0_i32_1 = arith.constant 0 : i32
    return %c0_i32, %c0_i32_0 : i32, i32
  }
  func.func @transform_4(%arg0: i32) -> (i32, i32) {
    %c0_i32 = arith.constant 0 : i32
    %c0_i32_0 = arith.constant 0 : i32
    %c0_i32_1 = arith.constant 0 : i32
    return %c0_i32, %c0_i32_0 : i32, i32
  }
  func.func @transform_5(%arg0: i32) -> (i32, i32) {
    %c0_i32 = arith.constant 0 : i32
    %c0_i32_0 = arith.constant 0 : i32
    %c0_i32_1 = arith.constant 0 : i32
    return %c0_i32, %c0_i32_0 : i32, i32
  }
  func.func @transform_6(%arg0: i32) -> (i32, i32) {
    %c0_i32 = arith.constant 0 : i32
    %c0_i32_0 = arith.constant 0 : i32
    %c0_i32_1 = arith.constant 0 : i32
    return %c0_i32, %c0_i32_0 : i32, i32
  }
  func.func @transform_7(%arg0: i32) -> (i32, i32) {
    %c0_i32 = arith.constant 0 : i32
    %c0_i32_0 = arith.constant 0 : i32
    return %arg0, %c0_i32 : i32, i32
  }
}

module attributes {stable_mosaic.version = 11 : i64} {
  func.func @_mlp_kernel(%arg0: i32, %arg1: memref<8x64xf32, #tpu.memory_space<vmem>>, %arg2: memref<64x32xbf16, #tpu.memory_space<vmem>>, %arg3: memref<1x32xf32, #tpu.memory_space<vmem>>, %arg4: memref<32x16xbf16, #tpu.memory_space<vmem>>, %arg5: memref<1x16xf32, #tpu.memory_space<vmem>>, %arg6: memref<1x16xf32, #tpu.memory_space<vmem>>, %arg7: memref<1x1xf32, #tpu.memory_space<vmem>>, %arg8: memref<8x1xf32, #tpu.memory_space<vmem>>) attributes {dimension_semantics = [#tpu.dimension_semantics<parallel>], iteration_bounds = array<i64: 1>, scalar_prefetch = 0 : i64, scratch_operands = 0 : i64, tpu.core_type = #tpu.core_type<tc>, window_params = [{transform_indices = @transform_0, window_bounds = array<i64: 8, 64>}, {pipeline_mode = #tpu.pipeline_mode<synchronous>, transform_indices = @transform_1, window_bounds = array<i64: 64, 32>}, {pipeline_mode = #tpu.pipeline_mode<synchronous>, transform_indices = @transform_2, window_bounds = array<i64: 1, 32>}, {pipeline_mode = #tpu.pipeline_mode<synchronous>, transform_indices = @transform_3, window_bounds = array<i64: 32, 16>}, {pipeline_mode = #tpu.pipeline_mode<synchronous>, transform_indices = @transform_4, window_bounds = array<i64: 1, 16>}, {pipeline_mode = #tpu.pipeline_mode<synchronous>, transform_indices = @transform_5, window_bounds = array<i64: 1, 16>}, {pipeline_mode = #tpu.pipeline_mode<synchronous>, transform_indices = @transform_6, window_bounds = array<i64: 1, 1>}, {transform_indices = @transform_7, window_bounds = array<i64: 8, 1>}]} {
    %c0 = arith.constant 0 : index
    %c0_0 = arith.constant 0 : index
    %0 = vector.load %arg1[%c0, %c0_0] : memref<8x64xf32, #tpu.memory_space<vmem>>, vector<8x64xf32>
    %1 = arith.truncf %0 : vector<8x64xf32> to vector<8x64xbf16>
    %c0_1 = arith.constant 0 : index
    %c0_2 = arith.constant 0 : index
    %2 = vector.load %arg2[%c0_1, %c0_2] : memref<64x32xbf16, #tpu.memory_space<vmem>>, vector<64x32xbf16>
    %cst = arith.constant dense<0.000000e+00> : vector<8x32xf32>
    %3 = tpu.matmul %1, %2, %cst {dimension_numbers = #tpu.dot_dimension_numbers<[1], [0], [0], [1], [0, 0, 1, 1], [], []>} : vector<8x64xbf16>, vector<64x32xbf16>, vector<8x32xf32> -> vector<8x32xf32>
    %c0_3 = arith.constant 0 : index
    %c0_4 = arith.constant 0 : index
    %4 = vector.load %arg3[%c0_3, %c0_4] : memref<1x32xf32, #tpu.memory_space<vmem>>, vector<1x32xf32>
    %5 = vector.broadcast %4 : vector<1x32xf32> to vector<8x32xf32>
    %6 = arith.addf %3, %5 : vector<8x32xf32>
    %cst_5 = arith.constant 0.000000e+00 : f32
    %7 = vector.broadcast %cst_5 : f32 to vector<8x32xf32>
    %8 = arith.maximumf %6, %7 : vector<8x32xf32>
    %9 = arith.truncf %8 : vector<8x32xf32> to vector<8x32xbf16>
    %c0_6 = arith.constant 0 : index
    %c0_7 = arith.constant 0 : index
    %10 = vector.load %arg4[%c0_6, %c0_7] : memref<32x16xbf16, #tpu.memory_space<vmem>>, vector<32x16xbf16>
    %cst_8 = arith.constant dense<0.000000e+00> : vector<8x16xf32>
    %11 = tpu.matmul %9, %10, %cst_8 {dimension_numbers = #tpu.dot_dimension_numbers<[1], [0], [0], [1], [0, 0, 1, 1], [], []>} : vector<8x32xbf16>, vector<32x16xbf16>, vector<8x16xf32> -> vector<8x16xf32>
    %c0_9 = arith.constant 0 : index
    %c0_10 = arith.constant 0 : index
    %12 = vector.load %arg5[%c0_9, %c0_10] : memref<1x16xf32, #tpu.memory_space<vmem>>, vector<1x16xf32>
    %13 = vector.broadcast %12 : vector<1x16xf32> to vector<8x16xf32>
    %14 = arith.addf %11, %13 : vector<8x16xf32>
    %cst_11 = arith.constant 0.000000e+00 : f32
    %15 = vector.broadcast %cst_11 : f32 to vector<8x16xf32>
    %16 = arith.maximumf %14, %15 : vector<8x16xf32>
    %c0_12 = arith.constant 0 : index
    %c0_13 = arith.constant 0 : index
    %17 = vector.load %arg6[%c0_12, %c0_13] : memref<1x16xf32, #tpu.memory_space<vmem>>, vector<1x16xf32>
    %18 = vector.broadcast %17 : vector<1x16xf32> to vector<8x16xf32>
    %19 = arith.mulf %16, %18 : vector<8x16xf32>
    %cst_14 = arith.constant dense<0.000000e+00> : vector<8xf32>
    %20 = vector.multi_reduction <add>, %19, %cst_14 [1] : vector<8x16xf32> to vector<8xf32>
    %21 = vector.shape_cast %20 : vector<8xf32> to vector<8x1xf32>
    %c0_15 = arith.constant 0 : index
    %c0_16 = arith.constant 0 : index
    %22 = vector.load %arg7[%c0_15, %c0_16] : memref<1x1xf32, #tpu.memory_space<vmem>>, vector<1x1xf32>
    %23 = vector.broadcast %22 : vector<1x1xf32> to vector<8x1xf32>
    %24 = arith.addf %21, %23 : vector<8x1xf32>
    %c0_17 = arith.constant 0 : index
    %c0_18 = arith.constant 0 : index
    %25 = vector.load %arg8[%c0_17, %c0_18] : memref<8x1xf32, #tpu.memory_space<vmem>>, vector<8x1xf32>
    tpu.vector_store %arg8[%c0_17, %c0_18], %24 {strides = array<i32>} : memref<8x1xf32, #tpu.memory_space<vmem>>, vector<8x1xf32>,
    return
  }
  func.func @transform_0(%arg0: i32) -> (i32, i32) {
    %c0_i32 = arith.constant 0 : i32
    %c0_i32_0 = arith.constant 0 : i32
    return %arg0, %c0_i32 : i32, i32
  }
  func.func @transform_1(%arg0: i32) -> (i32, i32) {
    %c0_i32 = arith.constant 0 : i32
    %c0_i32_0 = arith.constant 0 : i32
    %c0_i32_1 = arith.constant 0 : i32
    return %c0_i32, %c0_i32_0 : i32, i32
  }
  func.func @transform_2(%arg0: i32) -> (i32, i32) {
    %c0_i32 = arith.constant 0 : i32
    %c0_i32_0 = arith.constant 0 : i32
    %c0_i32_1 = arith.constant 0 : i32
    return %c0_i32, %c0_i32_0 : i32, i32
  }
  func.func @transform_3(%arg0: i32) -> (i32, i32) {
    %c0_i32 = arith.constant 0 : i32
    %c0_i32_0 = arith.constant 0 : i32
    %c0_i32_1 = arith.constant 0 : i32
    return %c0_i32, %c0_i32_0 : i32, i32
  }
  func.func @transform_4(%arg0: i32) -> (i32, i32) {
    %c0_i32 = arith.constant 0 : i32
    %c0_i32_0 = arith.constant 0 : i32
    %c0_i32_1 = arith.constant 0 : i32
    return %c0_i32, %c0_i32_0 : i32, i32
  }
  func.func @transform_5(%arg0: i32) -> (i32, i32) {
    %c0_i32 = arith.constant 0 : i32
    %c0_i32_0 = arith.constant 0 : i32
    %c0_i32_1 = arith.constant 0 : i32
    return %c0_i32, %c0_i32_0 : i32, i32
  }
  func.func @transform_6(%arg0: i32) -> (i32, i32) {
    %c0_i32 = arith.constant 0 : i32
    %c0_i32_0 = arith.constant 0 : i32
    %c0_i32_1 = arith.constant 0 : i32
    return %c0_i32, %c0_i32_0 : i32, i32
  }
  func.func @transform_7(%arg0: i32) -> (i32, i32) {
    %c0_i32 = arith.constant 0 : i32
    %c0_i32_0 = arith.constant 0 : i32
    return %arg0, %c0_i32 : i32, i32
  }
}

</mosaic_0001>

<bundles_post_ra>
// kernel: tpu_custom_call.1
= control target key start
LH: loop header
LB: loop body
LE: loop exit
PB: predicated region body
PF: predicated region fallthrough
CT: control target
= control target key end

     0   :  { %v258_v0 = vmov 0.0   ;;  %vm259_vm0 = vmmov 0   ;;  %vm70_vm1 = vcmask 523264   ;;  %vm139_vm2 = vcmask 261120   ;;  %s336_s1 = inlined_call_operand.vmem [shape: bf16[64,32], index: 1, kind: input, shape index: {}]   ;;  %s337_s0 = inlined_call_operand.vmem [shape: f32[8,64], index: 0, kind: input, shape index: {}]   ;;  %s338_s3 = inlined_call_operand.vmem [shape: bf16[32,16], index: 3, kind: input, shape index: {}]   ;;  %s339_s2 = inlined_call_operand.vmem [shape: f32[1,32], index: 2, kind: input, shape index: {}]   ;;  %s340_s6 = inlined_call_operand.<no memory space> [shape: f32[1,1], index: 6, kind: input, shape index: {}]   ;;  %s341_s4 = inlined_call_operand.vmem [shape: f32[1,16], index: 4, kind: input, shape index: {}]   ;;  %s342_s5 = inlined_call_operand.vmem [shape: f32[1,16], index: 5, kind: input, shape index: {}]   ;;  %s343_s7 = inlined_call_operand.vmem [shape: f32[8,1], index: 7, kind: output, shape index: {}]  }
   0x1   :  { %230 = vmatprep.subr.bf16.mxu0 %v258_v0  ;;  %v252_v1 = vld [vmem:[%s336_s1 + $0x18] sm:$0xff]   ;;  %238 = vmatprep.mubr.msk.bf16.mxu0 %vm259_vm0, %v258_v0  ;;  %v253_v2 = vld [vmem:[%s336_s1 + $0x10] sm:$0xff]   ;;  %v254_v3 = vld [vmem:[%s336_s1 + $0x8] sm:$0xff]   ;;  %v12_v17 = vstv %s340_s6  ;;  %vm192_vm3 = vcmask 130048   ;;  %vm204_vm4 = vcmask 7168  }
   0x2   :  { %242 = vmatprep.subr.bf16.mxu1 %v258_v0  ;;  %246 = vmatprep.mubr.msk.bf16.mxu1 %vm259_vm0, %v258_v0  ;;  %v255_v4 = vld [vmem:[%s336_s1] sm:$0xff]   ;;  %v256_v7 = vld [vmem:[%s338_s3 + $0x8] sm:$0xff]   ;;  %13 = vst [vmem:[#allocation2] sm:$0x1] %v12_v17 }
   0x3   :  { %231 = vmatpush3.bf16.msra.mxu0 %v252_v1  ;;  %v29_v5 = vld [vmem:[%s337_s0] sm:$0xff]  ;;  %243 = vmatpush3.bf16.msra.mxu1 %v256_v7 }
   0x4   :  { %232 = vmatprep.subr.bf16.mxu0 %v258_v0  ;;  %v30_v6 = vpack.c.bf16 %v29_v5, %v29_v5  ;;  %244 = vmatprep.subr.bf16.mxu1 %v258_v0  ;;  %v257_v8 = vld [vmem:[%s338_s3] sm:$0xff]  }
   0x5   :  { %v210_v9 = vld [vmem:[%s339_s2] ss:$0 sm:$0xff] }
   0x6   :  { %v216_v18 = vld [vmem:[%s341_s4] ss:$0 sm:$0xff] }
   0x7   :  { %233 = vmatpush3.bf16.msra.mxu0 %v253_v2  ;;  %245 = vmatpush3.bf16.msra.mxu1 %v257_v8  ;;  %v220_v22 = vld [vmem:[%s342_s5] ss:$0 sm:$0xff] }
   0x8   :  { %234 = vmatprep.subr.bf16.mxu0 %v258_v0 }
   0x9   :  { %v221_v28 = vld [vmem:[#allocation2] ss:$0 sm:$0xff] }
   0xb   :  { %235 = vmatpush3.bf16.msra.mxu0 %v254_v3 }
   0xc   :  { %236 = vmatprep.subr.bf16.mxu0 %v258_v0 }
   0xf   :  { %237 = vmatpush3.bf16.msra.mxu0 %v255_v4 }
  0x12   :  { %239 = vmatmul.mubr.msk.bf16.vlgmr.msra.gmra.mxu0 %vm70_vm1, %v30_v6 }
  0xd2   :  { %v108_v10 = vpop.f32.mrf.mxu0 }
  0xd3   :  { %v109_v11 = vadd.f32 %v210_v9, %v108_v10 }
  0xd4   :  { %v240_v12 = vpop.f32.mrf.mxu0 }
  0xd5   :  { %v114_v13 = vmax.f32 %v109_v11, 0.0 }
  0xd6   :  { %v111_v14 = vpop.f32.mrf.mxu0 }
  0xd7   :  { %v115_v15 = vpack.c.bf16 %v114_v13, %v114_v13 }
  0xd8   :  { %v241_v16 = vpop.f32.mrf.mxu0 }
  0xd9   :  { %247 = vmatmul.mubr.msk.bf16.vlgmr.msra.gmra.mxu1 %vm139_vm2, %v115_v15 }
 0x199   :  { %v177_v19 = vpop.f32.mrf.mxu1 }
 0x19a   :  { %v178_v20 = vadd.f32 %v216_v18, %v177_v19 }
 0x19b   :  { %v248_v21 = vpop.f32.mrf.mxu1 }
 0x19c   :  { %v183_v23 = vmax.f32 %v178_v20, 0.0 }
 0x19d   :  { %v180_v24 = vpop.f32.mrf.mxu1 }
 0x19e   :  { %v191_v25 = vmul.f32 %v220_v22, %v183_v23 }
 0x19f   :  { %v249_v26 = vpop.f32.mrf.mxu1 }
 0x1a0   :  { %v193_v27 = vsel %vm192_vm3, %v191_v25, 0.0 }
 0x1a1   :  { %194 = vadd.xlane.f32.xlu0 %v193_v27 }
 0x22a   :  { %v195_v29 = vpop.xlane.xlu0 %194 }
 0x22b   :  { %v203_v30 = vadd.f32 %v221_v28, %v195_v29 }
 0x22d   :  { %205 = vst.msk [vmem:[%s343_s7] sm:$0xff] %vm204_vm4, %v203_v30 }

// kernel: tpu_custom_call.1
= control target key start
LH: loop header
LB: loop body
LE: loop exit
PB: predicated region body
PF: predicated region fallthrough
CT: control target
= control target key end

     0   :  { %v258_v0 = vmov 0.0   ;;  %vm259_vm0 = vmmov 0   ;;  %vm70_vm1 = vcmask 523264   ;;  %vm139_vm2 = vcmask 261120   ;;  %s336_s1 = inlined_call_operand.vmem [shape: bf16[64,32], index: 1, kind: input, shape index: {}]   ;;  %s337_s0 = inlined_call_operand.vmem [shape: f32[8,64], index: 0, kind: input, shape index: {}]   ;;  %s338_s3 = inlined_call_operand.vmem [shape: bf16[32,16], index: 3, kind: input, shape index: {}]   ;;  %s339_s2 = inlined_call_operand.vmem [shape: f32[1,32], index: 2, kind: input, shape index: {}]   ;;  %s340_s6 = inlined_call_operand.<no memory space> [shape: f32[1,1], index: 6, kind: input, shape index: {}]   ;;  %s341_s4 = inlined_call_operand.vmem [shape: f32[1,16], index: 4, kind: input, shape index: {}]   ;;  %s342_s5 = inlined_call_operand.vmem [shape: f32[1,16], index: 5, kind: input, shape index: {}]   ;;  %s343_s7 = inlined_call_operand.vmem [shape: f32[8,1], index: 7, kind: output, shape index: {}]  }
   0x1   :  { %230 = vmatprep.subr.bf16.mxu0 %v258_v0  ;;  %v252_v1 = vld [vmem:[%s336_s1 + $0x18] sm:$0xff]   ;;  %238 = vmatprep.mubr.msk.bf16.mxu0 %vm259_vm0, %v258_v0  ;;  %v253_v2 = vld [vmem:[%s336_s1 + $0x10] sm:$0xff]   ;;  %v254_v3 = vld [vmem:[%s336_s1 + $0x8] sm:$0xff]   ;;  %v12_v17 = vstv %s340_s6  ;;  %vm192_vm3 = vcmask 130048   ;;  %vm204_vm4 = vcmask 7168  }
   0x2   :  { %242 = vmatprep.subr.bf16.mxu1 %v258_v0  ;;  %246 = vmatprep.mubr.msk.bf16.mxu1 %vm259_vm0, %v258_v0  ;;  %v255_v4 = vld [vmem:[%s336_s1] sm:$0xff]   ;;  %v256_v7 = vld [vmem:[%s338_s3 + $0x8] sm:$0xff]   ;;  %13 = vst [vmem:[#allocation2] sm:$0x1] %v12_v17 }
   0x3   :  { %231 = vmatpush3.bf16.msra.mxu0 %v252_v1  ;;  %v29_v5 = vld [vmem:[%s337_s0] sm:$0xff]  ;;  %243 = vmatpush3.bf16.msra.mxu1 %v256_v7 }
   0x4   :  { %232 = vmatprep.subr.bf16.mxu0 %v258_v0  ;;  %v30_v6 = vpack.c.bf16 %v29_v5, %v29_v5  ;;  %244 = vmatprep.subr.bf16.mxu1 %v258_v0  ;;  %v257_v8 = vld [vmem:[%s338_s3] sm:$0xff]  }
   0x5   :  { %v210_v9 = vld [vmem:[%s339_s2] ss:$0 sm:$0xff] }
   0x6   :  { %v216_v18 = vld [vmem:[%s341_s4] ss:$0 sm:$0xff] }
   0x7   :  { %233 = vmatpush3.bf16.msra.mxu0 %v253_v2  ;;  %245 = vmatpush3.bf16.msra.mxu1 %v257_v8  ;;  %v220_v22 = vld [vmem:[%s342_s5] ss:$0 sm:$0xff] }
   0x8   :  { %234 = vmatprep.subr.bf16.mxu0 %v258_v0 }
   0x9   :  { %v221_v28 = vld [vmem:[#allocation2] ss:$0 sm:$0xff] }
   0xb   :  { %235 = vmatpush3.bf16.msra.mxu0 %v254_v3 }
   0xc   :  { %236 = vmatprep.subr.bf16.mxu0 %v258_v0 }
   0xf   :  { %237 = vmatpush3.bf16.msra.mxu0 %v255_v4 }
  0x12   :  { %239 = vmatmul.mubr.msk.bf16.vlgmr.msra.gmra.mxu0 %vm70_vm1, %v30_v6 }
  0xd2   :  { %v108_v10 = vpop.f32.mrf.mxu0 }
  0xd3   :  { %v109_v11 = vadd.f32 %v210_v9, %v108_v10 }
  0xd4   :  { %v240_v12 = vpop.f32.mrf.mxu0 }
  0xd5   :  { %v114_v13 = vmax.f32 %v109_v11, 0.0 }
  0xd6   :  { %v111_v14 = vpop.f32.mrf.mxu0 }
  0xd7   :  { %v115_v15 = vpack.c.bf16 %v114_v13, %v114_v13 }
  0xd8   :  { %v241_v16 = vpop.f32.mrf.mxu0 }
  0xd9   :  { %247 = vmatmul.mubr.msk.bf16.vlgmr.msra.gmra.mxu1 %vm139_vm2, %v115_v15 }
 0x199   :  { %v177_v19 = vpop.f32.mrf.mxu1 }
 0x19a   :  { %v178_v20 = vadd.f32 %v216_v18, %v177_v19 }
 0x19b   :  { %v248_v21 = vpop.f32.mrf.mxu1 }
 0x19c   :  { %v183_v23 = vmax.f32 %v178_v20, 0.0 }
 0x19d   :  { %v180_v24 = vpop.f32.mrf.mxu1 }
 0x19e   :  { %v191_v25 = vmul.f32 %v220_v22, %v183_v23 }
 0x19f   :  { %v249_v26 = vpop.f32.mrf.mxu1 }
 0x1a0   :  { %v193_v27 = vsel %vm192_vm3, %v191_v25, 0.0 }
 0x1a1   :  { %194 = vadd.xlane.f32.xlu0 %v193_v27 }
 0x22a   :  { %v195_v29 = vpop.xlane.xlu0 %194 }
 0x22b   :  { %v203_v30 = vadd.f32 %v221_v28, %v195_v29 }
 0x22d   :  { %205 = vst.msk [vmem:[%s343_s7] sm:$0xff] %vm204_vm4, %v203_v30 }

</bundles_post_ra>
